<compile_context>
chip_gen: v7x
topology: tpu7x:2x2x1
jax: 0.10.0
libtpu: 0.0.40
codegen_flags: <defaults>
</compile_context>

<pallas_src>
import functools

import jax
import jax.numpy as jnp
from jax.experimental import pallas as pl
from jax.experimental.pallas import tpu as pltpu


# ----------------------------------------------------------------------------
# Kernel 1: Shi-Tomasi corner response map (row-tiled, separable box filter)
# ----------------------------------------------------------------------------
def _shift_lane(a, s):
    """result[..., x] = a[..., x + s] (circular) — XLU lane roll."""
    w = a.shape[-1]
    return pltpu.roll(a, shift=(-s) % w, axis=a.ndim - 1)


def corner_response_kernel(img_ref, resp_ref, pxx_s, pyy_s, pxy_s, *,
                           row_tile, img_h):
    th = row_tile
    n = th + 2                         # halo: one gradient row above/below tile
    r = pl.program_id(1)
    row0 = pl.multiple_of(r * th, th)  # first output (original) row of tile

    # img_ref holds the whole edge-padded image (H+4 rows), VMEM-resident
    # across the row-tile axis. All vertical (sublane) shifts are plain offset
    # loads (vld slots have slack) — no sublane rolls burn the XLU slot.
    # Padded row p == original row (p - 2), edge-replicated at the borders.
    mid = img_ref[0, pl.ds(row0 + 1, n), :]   # original rows [row0-1, row0+th+1)
    up = img_ref[0, pl.ds(row0, n), :]        # one original row above `mid`
    dn = img_ref[0, pl.ds(row0 + 2, n), :]    # one original row below `mid`

    # Central-difference gradients: horizontal = 2 lane rolls, vertical = pure
    # arithmetic on the offset-loaded slabs.
    ix = 0.5 * (_shift_lane(mid, 1) - _shift_lane(mid, -1))
    iy = 0.5 * (dn - up)

    # Structure-tensor products, written to VMEM scratch so the *vertical*
    # half of the separable 3x3 box filter is offset loads instead of rolls.
    pxx_s[0:n, :] = ix * ix
    pyy_s[0:n, :] = iy * iy
    pxy_s[0:n, :] = ix * iy

    def sep_box3(p_ref):
        # vertical pass: offset loads from scratch (vld slots, no XLU)
        v = p_ref[0:th, :] + p_ref[1:th + 1, :] + p_ref[2:th + 2, :]
        # horizontal pass: 2 lane rolls
        return v + _shift_lane(v, 1) + _shift_lane(v, -1)

    sxx = sep_box3(pxx_s)
    syy = sep_box3(pyy_s)
    sxy = sep_box3(pxy_s)

    tr = sxx + syy
    df = sxx - syy
    # Min eigenvalue of the 2x2 structure tensor (Shi-Tomasi quality).
    resp = 0.5 * (tr - jnp.sqrt(df * df + 4.0 * sxy * sxy))

    # Zero a 2-pixel border band: lane rolls wrap left/right columns into each
    # other (cv2 reflects); suppress spurious border responses before top-k.
    w = resp.shape[-1]
    rows = jax.lax.broadcasted_iota(jnp.int32, (th, w), 0) + row0
    cols = jax.lax.broadcasted_iota(jnp.int32, (th, w), 1)
    interior = ((rows >= 2) & (rows < img_h - 2) &
                (cols >= 2) & (cols < w - 2))
    resp_ref[0] = jnp.where(interior, resp, 0.0)


def corner_response(images_padded, *, out_h, row_tile):
    """images_padded: [B, out_h+4, W] (2 edge rows top/bottom) -> [B, out_h, W]."""
    B, Hp, W = images_padded.shape
    assert Hp == out_h + 4
    nt = out_h // row_tile
    kernel = functools.partial(corner_response_kernel,
                               row_tile=row_tile, img_h=out_h)
    return pl.pallas_call(
        kernel,
        out_shape=jax.ShapeDtypeStruct((B, out_h, W), jnp.float32),
        grid_spec=pltpu.PrefetchScalarGridSpec(
            num_scalar_prefetch=0,
            grid=(B, nt),
            # Full padded image stays VMEM-resident across the row-tile axis
            # (index map constant in r), so the halo is just an offset load.
            in_specs=[pl.BlockSpec((1, Hp, W), lambda b, r: (b, 0, 0))],
            out_specs=pl.BlockSpec((1, row_tile, W), lambda b, r: (b, r, 0)),
            scratch_shapes=[pltpu.VMEM((row_tile + 8, W), jnp.float32)] * 3,
        ),
        compiler_params=pltpu.CompilerParams(
            dimension_semantics=("parallel", "parallel")),
    )(images_padded)


def _pick_row_tile(h, max_tile=128):
    """Largest multiple of 8 that divides H and is <= max_tile (keeps per-tile
    temporaries small enough for v5e's 16 MiB / v7x's default scoped VMEM)."""
    best = None
    t = 8
    while t <= min(h, max_tile):
        if h % t == 0:
            best = t
        t += 8
    if best is None:
        raise ValueError("image height must be a multiple of 8")
    return best


# ----------------------------------------------------------------------------
# Kernel 2: anchor box construction + clipping + fill (single lane-dense store)
# ----------------------------------------------------------------------------
def anchor_box_kernel(xs_ref, ys_ref, valid_ref, boxes_ref, *,
                      half_w, half_h, img_w, img_h, fill):
    xs = xs_ref[...][:, None, :]          # (B, 1, M)
    ys = ys_ref[...][:, None, :]
    keep = valid_ref[...][:, None, :] > 0.5

    B, _, M = boxes_ref.shape
    c = jax.lax.broadcasted_iota(jnp.int32, (B, 4, M), 1)   # coord idx 0..3
    is_x = (c % 2) == 0                    # 0,2 -> x ; 1,3 -> y
    is_min = c < 2                         # 0,1 -> min ; 2,3 -> max

    center = jnp.where(is_x, xs, ys)
    half = jnp.where(is_x, half_w, half_h)
    hi = jnp.where(is_x, img_w, img_h)
    coord = jnp.where(is_min, center - half, center + half)
    coord = jnp.clip(coord, 0.0, hi)       # clip_boxes_to_image

    # One full lane-dense store (M padded to a multiple of 128 by the wrapper).
    boxes_ref[...] = jnp.where(keep, coord, fill)


def anchor_boxes(xs, ys, valid, *, anc_size, img_h, img_w, min_distance):
    B, M = xs.shape
    m_pad = ((M + 127) // 128) * 128       # lane-dense output width
    if m_pad != M:
        pad = ((0, 0), (0, m_pad - M))
        xs = jnp.pad(xs, pad)
        ys = jnp.pad(ys, pad)
        valid = jnp.pad(valid, pad)        # padded slots -> invalid -> fill

    kernel = functools.partial(
        anchor_box_kernel,
        half_w=float(anc_size[1] // 2),
        half_h=float(anc_size[0] // 2),
        img_w=float(img_w),
        img_h=float(img_h),
        fill=-float(min_distance),
    )
    boxes_lane = pl.pallas_call(
        kernel,
        out_shape=jax.ShapeDtypeStruct((B, 4, m_pad), jnp.float32),
        in_specs=[pl.BlockSpec(memory_space=pltpu.MemorySpace.VMEM)] * 3,
        out_specs=pl.BlockSpec(memory_space=pltpu.MemorySpace.VMEM),
    )(xs, ys, valid)
    # [B, 4, M_pad] (lane-dense) -> [B, M, 4] to match the PyTorch output.
    return jnp.transpose(boxes_lane, (0, 2, 1))[:, :M, :]


# ----------------------------------------------------------------------------
# Module wrapper
# ----------------------------------------------------------------------------
class AnchorGeneratorPallas:
    """Pallas re-implementation of AnchorGenerator.forward (no learned params)."""

    def __init__(self, anc_size=(31, 31), max_corners=600,
                 quality_level=0.002, min_distance=31, row_tile=None):
        self.anc_size = anc_size
        self.max_corners = max_corners
        self.quality_level = quality_level
        self.min_distance = min_distance
        self.row_tile = row_tile

    def _resolve_row_tile(self, h):
        th = self.row_tile if self.row_tile is not None else _pick_row_tile(h)
        if h % th != 0 or th % 8 != 0:
            raise ValueError(f"row_tile={th} must be a multiple of 8 dividing H={h}")
        return th

    def response(self, images):
        """Shi-Tomasi min-eigenvalue response map, [B, H, W] -> [B, H, W]."""
        B, H, W = images.shape
        th = self._resolve_row_tile(H)
        padded = jnp.pad(images, ((0, 0), (2, 2), (0, 0)), mode="edge")
        return corner_response(padded, out_h=H, row_tile=th)

    def __call__(self, images):
        B, H, W = images.shape
        resp = self.response(images)                             # [B, H, W]
        resp_flat = resp.reshape(B, H * W)

        # TODO(synk): fuse the per-image max / a per-tile partial top-k into
        # the response kernel (Mosaic has no sort primitive); for now the
        # selection stays in XLA and re-reads the response map from HBM.
        max_resp = jnp.max(resp_flat, axis=1, keepdims=True)     # [B, 1]
        vals, idxs = jax.lax.top_k(resp_flat, self.max_corners)  # [B, M]

        # cv2 quality threshold: keep corners with resp >= q * max_response.
        valid = ((vals >= self.quality_level * max_resp) &
                 (max_resp > 0)).astype(jnp.float32)

        ys = (idxs // W).astype(jnp.float32)   # row -> y
        xs = (idxs % W).astype(jnp.float32)    # col -> x

        return anchor_boxes(xs, ys, valid,
                            anc_size=self.anc_size,
                            img_h=H, img_w=W,
                            min_distance=self.min_distance)


# ----------------------------------------------------------------------------
# Pure-JAX reference for the response kernel (correctness check)
# ----------------------------------------------------------------------------
def _corner_response_ref(images):
    B, H, W = images.shape
    pad = jnp.pad(images, ((0, 0), (2, 2), (0, 0)), mode="edge")

    def shift_lane(a, s):
        return jnp.roll(a, -s, axis=-1)

    mid = pad[:, 1:H + 3, :]
    up = pad[:, 0:H + 2, :]
    dn = pad[:, 2:H + 4, :]
    ix = 0.5 * (shift_lane(mid, 1) - shift_lane(mid, -1))
    iy = 0.5 * (dn - up)
    pxx, pyy, pxy = ix * ix, iy * iy, ix * iy

    def box3(p):
        v = p[:, 0:H, :] + p[:, 1:H + 1, :] + p[:, 2:H + 2, :]
        return v + shift_lane(v, 1) + shift_lane(v, -1)

    sxx, syy, sxy = box3(pxx), box3(pyy), box3(pxy)
    tr = sxx + syy
    df = sxx - syy
    resp = 0.5 * (tr - jnp.sqrt(df * df + 4.0 * sxy * sxy))
    rows = jnp.arange(H)[None, :, None]
    cols = jnp.arange(W)[None, None, :]
    interior = (rows >= 2) & (rows < H - 2) & (cols >= 2) & (cols < W - 2)
    return jnp.where(interior, resp, 0.0)


if __name__ == "__main__":
    key = jax.random.PRNGKey(0)
    B, C, H, W = 2, 1, 64, 128
    # NCHW grayscale input (channel dim squeezed like image.squeeze() in torch)
    x = jax.random.uniform(key, (B, C, H, W), dtype=jnp.float32)
    images = x[:, 0, :, :]   # [B, H, W]

    gen = AnchorGeneratorPallas(anc_size=(7, 7), max_corners=100,
                                quality_level=0.01, min_distance=4,
                                row_tile=16)
    boxes = jax.block_until_ready(gen(images))

    assert boxes.shape == (B, 100, 4), boxes.shape
    assert boxes.dtype == jnp.float32
    # Valid boxes are clipped inside the image; invalid slots are -min_distance.
    assert bool(jnp.all((boxes == -4.0) | ((boxes >= 0.0) & (boxes <= 128.0))))
    assert bool(jnp.any(boxes[..., 2] > 0.0))   # at least one real corner box

    # Kernel-1 check vs pure-JAX reference.
    resp = jax.block_until_ready(gen.response(images))
    resp_ref = _corner_response_ref(images)
    assert bool(jnp.allclose(resp, resp_ref, rtol=1e-3, atol=1e-4)), \
        float(jnp.max(jnp.abs(resp - resp_ref)))

    # Kernel-2 check: run the same selection glue on the Pallas response and
    # compute the boxes in plain jnp.
    resp_flat = resp.reshape(B, H * W)
    max_resp = jnp.max(resp_flat, axis=1, keepdims=True)
    vals, idxs = jax.lax.top_k(resp_flat, gen.max_corners)
    valid = (vals >= gen.quality_level * max_resp) & (max_resp > 0)
    ys = (idxs // W).astype(jnp.float32)
    xs = (idxs % W).astype(jnp.float32)
    hw, hh = float(gen.anc_size[1] // 2), float(gen.anc_size[0] // 2)
    ref_boxes = jnp.stack(
        [jnp.clip(xs - hw, 0.0, float(W)), jnp.clip(ys - hh, 0.0, float(H)),
         jnp.clip(xs + hw, 0.0, float(W)), jnp.clip(ys + hh, 0.0, float(H))],
        axis=-1)
    ref_boxes = jnp.where(valid[..., None], ref_boxes, -float(gen.min_distance))
    assert bool(jnp.allclose(boxes, ref_boxes, atol=1e-5))

    print("KERNEL_OK")
</pallas_src>

<mosaic_0001>
module attributes {stable_mosaic.version = 11 : i64} {
  func.func @corner_response_kernel(%arg0: i32, %arg1: i32, %arg2: memref<1x68x128xf32, #tpu.memory_space<vmem>>, %arg3: memref<1x16x128xf32, #tpu.memory_space<vmem>>, %arg4: memref<24x128xf32, #tpu.memory_space<vmem>>, %arg5: memref<24x128xf32, #tpu.memory_space<vmem>>, %arg6: memref<24x128xf32, #tpu.memory_space<vmem>>) attributes {dimension_semantics = [#tpu.dimension_semantics<parallel>, #tpu.dimension_semantics<parallel>], iteration_bounds = array<i64: 2, 4>, scalar_prefetch = 0 : i64, scratch_operands = 3 : i64, tpu.core_type = #tpu.core_type<tc>, window_params = [{transform_indices = @transform_0, window_bounds = array<i64: 1, 68, 128>}, {transform_indices = @transform_1, window_bounds = array<i64: 1, 16, 128>}]} {
    %c16_i32 = arith.constant 16 : i32
    %0 = arith.muli %arg1, %c16_i32 : i32
    %1 = tpu.assume_multiple %0, 16 : i32
    %c1_i32 = arith.constant 1 : i32
    %2 = arith.addi %1, %c1_i32 : i32
    %c0 = arith.constant 0 : index
    %3 = arith.index_cast %2 : i32 to index
    %c0_0 = arith.constant 0 : index
    %4 = vector.load %arg2[%c0, %3, %c0_0] : memref<1x68x128xf32, #tpu.memory_space<vmem>>, vector<1x18x128xf32>
    %5 = vector.shape_cast %4 : vector<1x18x128xf32> to vector<18x128xf32>
    %c0_1 = arith.constant 0 : index
    %6 = arith.index_cast %1 : i32 to index
    %c0_2 = arith.constant 0 : index
    %7 = vector.load %arg2[%c0_1, %6, %c0_2] : memref<1x68x128xf32, #tpu.memory_space<vmem>>, vector<1x18x128xf32>
    %8 = vector.shape_cast %7 : vector<1x18x128xf32> to vector<18x128xf32>
    %c2_i32 = arith.constant 2 : i32
    %9 = arith.addi %1, %c2_i32 : i32
    %c0_3 = arith.constant 0 : index
    %10 = arith.index_cast %9 : i32 to index
    %c0_4 = arith.constant 0 : index
    %11 = vector.load %arg2[%c0_3, %10, %c0_4] : memref<1x68x128xf32, #tpu.memory_space<vmem>>, vector<1x18x128xf32>
    %12 = vector.shape_cast %11 : vector<1x18x128xf32> to vector<18x128xf32>
    %c127_i32 = arith.constant 127 : i32
    %13 = tpu.dynamic_rotate %5 by %c127_i32 dim 1 : vector<18x128xf32>, i32 -> vector<18x128xf32>
    %c1_i32_5 = arith.constant 1 : i32
    %14 = tpu.dynamic_rotate %5 by %c1_i32_5 dim 1 : vector<18x128xf32>, i32 -> vector<18x128xf32>
    %15 = arith.subf %13, %14 : vector<18x128xf32>
    %cst = arith.constant 5.000000e-01 : f32
    %16 = vector.broadcast %cst : f32 to vector<18x128xf32>
    %17 = arith.mulf %16, %15 : vector<18x128xf32>
    %18 = arith.subf %12, %8 : vector<18x128xf32>
    %cst_6 = arith.constant 5.000000e-01 : f32
    %19 = vector.broadcast %cst_6 : f32 to vector<18x128xf32>
    %20 = arith.mulf %19, %18 : vector<18x128xf32>
    %21 = arith.mulf %17, %17 : vector<18x128xf32>
    %c0_7 = arith.constant 0 : index
    %c0_8 = arith.constant 0 : index
    %22 = vector.load %arg4[%c0_7, %c0_8] : memref<24x128xf32, #tpu.memory_space<vmem>>, vector<18x128xf32>
    tpu.vector_store %arg4[%c0_7, %c0_8], %21 {strides = array<i32>} : memref<24x128xf32, #tpu.memory_space<vmem>>, vector<18x128xf32>,
    %23 = arith.mulf %20, %20 : vector<18x128xf32>
    %c0_9 = arith.constant 0 : index
    %c0_10 = arith.constant 0 : index
    %24 = vector.load %arg5[%c0_9, %c0_10] : memref<24x128xf32, #tpu.memory_space<vmem>>, vector<18x128xf32>
    tpu.vector_store %arg5[%c0_9, %c0_10], %23 {strides = array<i32>} : memref<24x128xf32, #tpu.memory_space<vmem>>, vector<18x128xf32>,
    %25 = arith.mulf %17, %20 : vector<18x128xf32>
    %c0_11 = arith.constant 0 : index
    %c0_12 = arith.constant 0 : index
    %26 = vector.load %arg6[%c0_11, %c0_12] : memref<24x128xf32, #tpu.memory_space<vmem>>, vector<18x128xf32>
    tpu.vector_store %arg6[%c0_11, %c0_12], %25 {strides = array<i32>} : memref<24x128xf32, #tpu.memory_space<vmem>>, vector<18x128xf32>,
    %c0_13 = arith.constant 0 : index
    %c0_14 = arith.constant 0 : index
    %27 = vector.load %arg4[%c0_13, %c0_14] : memref<24x128xf32, #tpu.memory_space<vmem>>, vector<16x128xf32>
    %c1 = arith.constant 1 : index
    %c0_15 = arith.constant 0 : index
    %28 = vector.load %arg4[%c1, %c0_15] : memref<24x128xf32, #tpu.memory_space<vmem>>, vector<16x128xf32>
    %29 = arith.addf %27, %28 : vector<16x128xf32>
    %c2 = arith.constant 2 : index
    %c0_16 = arith.constant 0 : index
    %30 = vector.load %arg4[%c2, %c0_16] : memref<24x128xf32, #tpu.memory_space<vmem>>, vector<16x128xf32>
    %31 = arith.addf %29, %30 : vector<16x128xf32>
    %c127_i32_17 = arith.constant 127 : i32
    %32 = tpu.dynamic_rotate %31 by %c127_i32_17 dim 1 : vector<16x128xf32>, i32 -> vector<16x128xf32>
    %33 = arith.addf %31, %32 : vector<16x128xf32>
    %c1_i32_18 = arith.constant 1 : i32
    %34 = tpu.dynamic_rotate %31 by %c1_i32_18 dim 1 : vector<16x128xf32>, i32 -> vector<16x128xf32>
    %35 = arith.addf %33, %34 : vector<16x128xf32>
    %c0_19 = arith.constant 0 : index
    %c0_20 = arith.constant 0 : index
    %36 = vector.load %arg5[%c0_19, %c0_20] : memref<24x128xf32, #tpu.memory_space<vmem>>, vector<16x128xf32>
    %c1_21 = arith.constant 1 : index
    %c0_22 = arith.constant 0 : index
    %37 = vector.load %arg5[%c1_21, %c0_22] : memref<24x128xf32, #tpu.memory_space<vmem>>, vector<16x128xf32>
    %38 = arith.addf %36, %37 : vector<16x128xf32>
    %c2_23 = arith.constant 2 : index
    %c0_24 = arith.constant 0 : index
    %39 = vector.load %arg5[%c2_23, %c0_24] : memref<24x128xf32, #tpu.memory_space<vmem>>, vector<16x128xf32>
    %40 = arith.addf %38, %39 : vector<16x128xf32>
    %c127_i32_25 = arith.constant 127 : i32
    %41 = tpu.dynamic_rotate %40 by %c127_i32_25 dim 1 : vector<16x128xf32>, i32 -> vector<16x128xf32>
    %42 = arith.addf %40, %41 : vector<16x128xf32>
    %c1_i32_26 = arith.constant 1 : i32
    %43 = tpu.dynamic_rotate %40 by %c1_i32_26 dim 1 : vector<16x128xf32>, i32 -> vector<16x128xf32>
    %44 = arith.addf %42, %43 : vector<16x128xf32>
    %c0_27 = arith.constant 0 : index
    %c0_28 = arith.constant 0 : index
    %45 = vector.load %arg6[%c0_27, %c0_28] : memref<24x128xf32, #tpu.memory_space<vmem>>, vector<16x128xf32>
    %c1_29 = arith.constant 1 : index
    %c0_30 = arith.constant 0 : index
    %46 = vector.load %arg6[%c1_29, %c0_30] : memref<24x128xf32, #tpu.memory_space<vmem>>, vector<16x128xf32>
    %47 = arith.addf %45, %46 : vector<16x128xf32>
    %c2_31 = arith.constant 2 : index
    %c0_32 = arith.constant 0 : index
    %48 = vector.load %arg6[%c2_31, %c0_32] : memref<24x128xf32, #tpu.memory_space<vmem>>, vector<16x128xf32>
    %49 = arith.addf %47, %48 : vector<16x128xf32>
    %c127_i32_33 = arith.constant 127 : i32
    %50 = tpu.dynamic_rotate %49 by %c127_i32_33 dim 1 : vector<16x128xf32>, i32 -> vector<16x128xf32>
    %51 = arith.addf %49, %50 : vector<16x128xf32>
    %c1_i32_34 = arith.constant 1 : i32
    %52 = tpu.dynamic_rotate %49 by %c1_i32_34 dim 1 : vector<16x128xf32>, i32 -> vector<16x128xf32>
    %53 = arith.addf %51, %52 : vector<16x128xf32>
    %54 = arith.addf %35, %44 : vector<16x128xf32>
    %55 = arith.subf %35, %44 : vector<16x128xf32>
    %56 = arith.mulf %55, %55 : vector<16x128xf32>
    %cst_35 = arith.constant 4.000000e+00 : f32
    %57 = vector.broadcast %cst_35 : f32 to vector<16x128xf32>
    %58 = arith.mulf %57, %53 : vector<16x128xf32>
    %59 = arith.mulf %58, %53 : vector<16x128xf32>
    %60 = arith.addf %56, %59 : vector<16x128xf32>
    %61 = math.sqrt %60 : vector<16x128xf32>
    %62 = arith.subf %54, %61 : vector<16x128xf32>
    %cst_36 = arith.constant 5.000000e-01 : f32
    %63 = vector.broadcast %cst_36 : f32 to vector<16x128xf32>
    %64 = arith.mulf %63, %62 : vector<16x128xf32>
    %65 = tpu.iota {dimensions = array<i32: 0>} : vector<16x128xi32>
    %66 = vector.broadcast %1 : i32 to vector<16x128xi32>
    %67 = arith.addi %65, %66 : vector<16x128xi32>
    %68 = tpu.iota {dimensions = array<i32: 1>} : vector<16x128xi32>
    %c2_i32_37 = arith.constant 2 : i32
    %69 = vector.broadcast %c2_i32_37 : i32 to vector<16x128xi32>
    %70 = arith.cmpi sge, %67, %69 : vector<16x128xi32>
    %c62_i32 = arith.constant 62 : i32
    %71 = vector.broadcast %c62_i32 : i32 to vector<16x128xi32>
    %72 = arith.cmpi slt, %67, %71 : vector<16x128xi32>
    %73 = arith.andi %70, %72 : vector<16x128xi1>
    %c2_i32_38 = arith.constant 2 : i32
    %74 = vector.broadcast %c2_i32_38 : i32 to vector<16x128xi32>
    %75 = arith.cmpi sge, %68, %74 : vector<16x128xi32>
    %76 = arith.andi %73, %75 : vector<16x128xi1>
    %c126_i32 = arith.constant 126 : i32
    %77 = vector.broadcast %c126_i32 : i32 to vector<16x128xi32>
    %78 = arith.cmpi slt, %68, %77 : vector<16x128xi32>
    %79 = arith.andi %76, %78 : vector<16x128xi1>
    %cst_39 = arith.constant 0.000000e+00 : f32
    %80 = vector.broadcast %cst_39 : f32 to vector<16x128xf32>
    %81 = arith.select %79, %64, %80 : vector<16x128xi1>, vector<16x128xf32>
    %c0_40 = arith.constant 0 : index
    %c0_41 = arith.constant 0 : index
    %c0_42 = arith.constant 0 : index
    %82 = vector.load %arg3[%c0_40, %c0_41, %c0_42] : memref<1x16x128xf32, #tpu.memory_space<vmem>>, vector<1x16x128xf32>
    %83 = vector.shape_cast %82 : vector<1x16x128xf32> to vector<16x128xf32>
    %84 = vector.shape_cast %81 : vector<16x128xf32> to vector<1x16x128xf32>
    tpu.vector_store %arg3[%c0_40, %c0_41, %c0_42], %84 {strides = array<i32>} : memref<1x16x128xf32, #tpu.memory_space<vmem>>, vector<1x16x128xf32>,
    return
  }
  func.func @transform_0(%arg0: i32, %arg1: i32) -> (i32, i32, i32) {
    %c0_i32 = arith.constant 0 : i32
    %c0_i32_0 = arith.constant 0 : i32
    %c0_i32_1 = arith.constant 0 : i32
    return %arg0, %c0_i32, %c0_i32_0 : i32, i32, i32
  }
  func.func @transform_1(%arg0: i32, %arg1: i32) -> (i32, i32, i32) {
    %c0_i32 = arith.constant 0 : i32
    %c0_i32_0 = arith.constant 0 : i32
    return %arg0, %arg1, %c0_i32 : i32, i32, i32
  }
}

</mosaic_0001>

<bundles_post_ra>
// kernel: tpu_custom_call.1
= control target key start
LH: loop header
LB: loop body
LE: loop exit
PB: predicated region body
PF: predicated region fallthrough
CT: control target
= control target key end

     0   :  { %6 = vsyncpa [#allocation6], 0  ;;  %s804_s0 = inlined_call_operand.vmem [shape: f32[2,68,128], index: 0, kind: input, shape index: {}]   ;;  %s805_s1 = inlined_call_operand.hbm [shape: f32[2,64,128], index: 1, kind: output, shape index: {}]  }
   0x1   :  { %8 = vsyncpa [#allocation6 + $0x1], 0  ;;  %s620_s6 = smov 0   ;;  %s622_s7 = smov 0  }
   0x2   :  { %s624_s8 = smov 0   ;;  %s626_s9 = smov 0  }
   0x3   :  { %s628_s10 = smov 0   ;;  %s630_s11 = smov 0  }
   0x4   :  { %s632_s12 = smov 0   ;;  %s634_s13 = smov 0  }
   0x5 LB: > { %s407_s14 = sadd.s32 4294967295, %s603_s13   ;;  %s408_s15 = sadd.s32 4294967294, %s603_s13   ;;  %s603_s13 = sphi %s634_s13, %s14_s13   ;;  %s599_s12 = sphi %s632_s12, %s818_s12   ;;  %s595_s11 = sphi %s630_s11, %s817_s11   ;;  %s591_s10 = sphi %s628_s10, %s816_s10   ;;  %s587_s9 = sphi %s626_s9, %s815_s9   ;;  %s583_s8 = sphi %s624_s8, %s814_s8   ;;  %s579_s7 = sphi %s622_s7, %s813_s7   ;;  %s575_s6 = sphi %s620_s6, %s812_s6  }
   0x6   : > { %s23_s16 = sadd.s32 1, %s595_s11  ;;  %s26_s17 = sadd.s32 1, %s599_s12 }
   0x7   : > { %p24_p0 = scmp.ge.s32.totalorder %s23_s16, 4  ;;  %p71_p1 = scmp.ne.s32.totalorder %s583_s8, %s579_s7 }
   0x8   : > { %p72_p2 = scmp.eq.s32.totalorder %s407_s14, 7  ;;  %p77_p5 = scmp.ne.s32.totalorder %s579_s7, %s575_s6 }
   0x9   : > { %s820_s16 = smov (%p24_p0, %s23_s16), 0  ;;  %s822_s17 = smov (!%p24_p0, %s26_s17), %s599_s12 }
   0xa   : > { %s57_s18 = ssub.s32 %s595_s11, %s820_s16  ;;  %p671_p3 = por %p72_p2, %p71_p1 }
   0xb   : > { %p28_p4 = scmp.ge.s32.totalorder %s822_s17, 2  ;;  %p78_p6 = scmp.eq.s32.totalorder %s408_s15, 7 }
   0xc   : > { %p411_p7 = scmp.ge.s32.totalorder %s603_s13, 1  ;;  %p104_p9 = scmp.lt.s32.totalorder %s603_s13, 9 }
   0xd   : > { %s824_s17 = smov (%p28_p4, %s822_s17), 0  ;;  %p680_p8 = por %p78_p6, %p77_p5 }
   0xe   : > { %s56_s21 = ssub.s32 %s599_s12, %s824_s17  ;;  %s61_s22 = sadd.s32 1, %s583_s8 }
   0xf   : > { %s58_s23 = sor.u32 %s57_s18, %s56_s21  ;;  %p105_p10 = pnand %p411_p7, %p104_p9 }
  0x10   : > { %p59_p11 = scmp.eq.s32.totalorder %s58_s23, 0  ;;  %p124_p12 = scmp.lt.s32.totalorder (!%p105_p10), %s591_s10, 1 }
  0x11   : > { %108 = sbr.rel (%p105_p10) target bundleno = 344 (0x158), region = 24  ;;  %s414_s27 = sshll.u32 (!%p105_p10), %s587_s9, 4 }
  0x12   : > { %s689_s24 = scalar_select %p59_p11, %s583_s8, %s61_s22  }
  0x13   : > { %s605_s3 = smov (!%p105_p10), 127   ;;  %s606_s4 = smov (!%p105_p10), 1  }
  0x14   : > { %s121_s5 = sand.u32 (!%p105_p10), 1, %s579_s7   ;;  %s424_s15 = sshll.u32 (!%p105_p10), %s587_s9, 1 }
  0x15   : > { %s722_s14 = sshll.u32 (!%p105_p10), %s121_s5, 4  ;;  %s425_s18 = sshll.u32 (!%p105_p10), %s591_s10, 3 }
  0x16   : > { %s320_s9 = sadd.s32 (!%p105_p10), %s425_s18, %s424_s15  ;;  %s123_s21 = scalar_lea.vmem (!%p105_p10), [#allocation5], %s722_s14 }
  0x17   : > { %s323_s22 = sshll.u32 (!%p105_p10), %s123_s21, 4  ;;  %s607_s29 = smov (!%p105_p10), [#allocation5]   ;;  %s748_s22 = int_to_ptr.vmem [resolvable:$true] %s323_s22 }
  0x18   : > { %s125_s25 = scalar_select %p124_p12, %s591_s10, 1 }
  0x19   : > { %s426_s10 = sshll.u32 %s320_s9, 7  ;;  %s509_s28 = scalar_lea.vmem %s748_s22, 256 }
  0x1a   : > { %s429_s26 = smul.u32 72, %s125_s25  ;;  %p510_p13 = scmp.ne.s32.totalorder %s748_s22, %s509_s28 }
  0x1c   : > { %s128_s30 = scalar_lea.vmem %s804_s0, %s429_s26  ;;  %s746_s26 = scalar_lea.hbm %s805_s1, %s426_s10 }
  0x1d   : > { %s357_s2 = scalar_lea.vmem %s128_s30, %s414_s27  ;;  %p511_p0 = pnand %p510_p13, %p671_p3 }
  0x1e   : > { %v418_v0 = vld [vmem:[%s357_s2 + $0x11] sm:$0x3]  ;;  %v416_v1 = vld [vmem:[%s357_s2 + $0x1] sm:$0xff]  ;;  %v417_v2 = vld [vmem:[%s357_s2 + $0x9] sm:$0xff]  ;;  %s513_s30 = sshll.u32 %s607_s29, 4  ;;  %s514_s30 = int_to_ptr.vmem [resolvable:$false] %s513_s30 }
  0x1f   : > { %149 = vrot.lane.b32.xlu1 %v418_v0, %s605_s3  ;;  %145 = vrot.lane.b32.xlu0 %v416_v1, %s605_s3  ;;  %v137_v3 = vld [vmem:[%s357_s2] sm:$0xff]  ;;  %v139_v6 = vld [vmem:[%s357_s2 + $0x10] sm:$0x3]  ;;  %p512_p1 = pneg %p511_p0  ;;  %p516_p2 = scmp.lt.s32.totalorder %s748_s22, %s514_s30 }
  0x20   : > { %v420_v4 = vld [vmem:[%s357_s2 + $0x2] sm:$0xff]  ;;  %v422_v7 = vld [vmem:[%s357_s2 + $0x12] sm:$0x3]  ;;  %v421_v10 = vld [vmem:[%s357_s2 + $0xa] sm:$0xff] }
  0x21   : > { %v163_v5 = vsub.f32 %v420_v4, %v137_v3  ;;  %v138_v8 = vld [vmem:[%s357_s2 + $0x8] sm:$0xff]  ;;  %v165_v9 = vsub.f32 %v422_v7, %v139_v6  ;;  %s515_s2 = scalar_lea.vmem %s514_s30, 512 }
  0x22   : > { %v164_v12 = vsub.f32 %v421_v10, %v138_v8  ;;  %p517_p4 = scmp.lt.s32.totalorder %s515_s2, %s509_s28 }
  0x23   : > { %v166_v11 = vmul.f32 0.5, %v163_v5  ;;  %151 = vrot.lane.b32.xlu1 %v416_v1, %s606_s4  ;;  %147 = vrot.lane.b32.xlu0 %v417_v2, %s605_s3  ;;  %v168_v13 = vmul.f32 0.5, %v165_v9 }
  0x24   : > { %v167_v15 = vmul.f32 0.5, %v164_v12  ;;  %p518_p5 = por %p517_p4, %p516_p2 }
  0x25   : > { %v175_v14 = vmul.f32 %v166_v11, %v166_v11  ;;  %v177_v16 = vmul.f32 %v168_v13, %v168_v13 }
  0x26   : > { %v176_v17 = vmul.f32 %v167_v15, %v167_v15  ;;  %p519_p6 = pnand %p518_p5, %p512_p1 }
  0x27   : > { %178 = vst [vmem:[#allocation3] sm:$0xff] %v175_v14  ;;  %155 = vrot.lane.b32.xlu1 %v418_v0, %s606_s4  ;;  %153 = vrot.lane.b32.xlu0 %v417_v2, %s606_s4  ;;  %180 = vst [vmem:[#allocation3 + $0x10] sm:$0x3] %v177_v16 }
  0x28   : > { %179 = vst [vmem:[#allocation3 + $0x8] sm:$0xff] %v176_v17 }
  0x2f   : > { %v212_v18 = vld [vmem:[#allocation3 + $0x9] sm:$0xff]  ;;  %v211_v20 = vld [vmem:[#allocation3 + $0x1] sm:$0xff] }
  0x30   : > { %v216_v19 = vld [vmem:[#allocation3 + $0xa] sm:$0xff]  ;;  %v214_v21 = vadd.f32 %v212_v18, %v176_v17  ;;  %v213_v22 = vadd.f32 %v211_v20, %v175_v14  ;;  %v215_v23 = vld [vmem:[#allocation3 + $0x2] sm:$0xff]  ;;  %v283_v18 = vlaneseq }
  0x32   : > { %v218_v24 = vadd.f32 %v216_v19, %v214_v21  ;;  %v217_v25 = vadd.f32 %v215_v23, %v213_v22 }
  0x34   : > { %221 = vrot.lane.b32.xlu1 %v218_v24, %s605_s3  ;;  %219 = vrot.lane.b32.xlu0 %v217_v25, %s605_s3 }
  0x38   : > { %227 = vrot.lane.b32.xlu1 %v218_v24, %s606_s4  ;;  %225 = vrot.lane.b32.xlu0 %v217_v25, %s606_s4 }
  0x91   : > { %v150_v26 = vpop.permute.xlu1 %149  ;;  %v146_v27 = vpop.permute.xlu0 %145 }
  0x95   : > { %v152_v28 = vpop.permute.xlu1 %151  ;;  %v148_v29 = vpop.permute.xlu0 %147 }
  0x96   : > { %v157_v30 = vsub.f32 %v146_v27, %v152_v28 }
  0x98   : > { %v160_v31 = vmul.f32 0.5, %v157_v30 }
  0x99   : > { %v156_v32 = vpop.permute.xlu1 %155  ;;  %v154_v33 = vpop.permute.xlu0 %153 }
  0x9a   : > { %v169_v34 = vmul.f32 %v160_v31, %v160_v31  ;;  %v181_v35 = vmul.f32 %v166_v11, %v160_v31  ;;  %v159_v36 = vsub.f32 %v150_v26, %v156_v32  ;;  %v158_v37 = vsub.f32 %v148_v29, %v154_v33 }
  0x9b   : > { %v286_v33 = vstv %s414_s27  ;;  %s752_s27 = scalar_lea.sflag [#allocation6], %s121_s5 }
  0x9c   : > { %172 = vst [vmem:[#allocation2] sm:$0xff] %v169_v34  ;;  %184 = vst [vmem:[#allocation4] sm:$0xff] %v181_v35  ;;  %v162_v38 = vmul.f32 0.5, %v159_v36  ;;  %v161_v39 = vmul.f32 0.5, %v158_v37  ;;  %v290_v36 = vand.u32 127, %v283_v18 }
  0x9e   : > { %v171_v40 = vmul.f32 %v162_v38, %v162_v38  ;;  %v183_v41 = vmul.f32 %v168_v13, %v162_v38  ;;  %v170_v42 = vmul.f32 %v161_v39, %v161_v39  ;;  %v182_v43 = vmul.f32 %v167_v15, %v161_v39 }
  0x9f   : > { %vm297_vm5 = vcmp.ge.s32.totalorder %v290_v36, 2  ;;  %vm300_vm7 = vcmp.lt.s32.totalorder %v290_v36, 126 }
  0xa0   : > { %174 = vst [vmem:[#allocation2 + $0x10] sm:$0x3] %v171_v40  ;;  %186 = vst [vmem:[#allocation4 + $0x10] sm:$0x3] %v183_v41 }
  0xa1   : > { %173 = vst [vmem:[#allocation2 + $0x8] sm:$0xff] %v170_v42  ;;  %185 = vst [vmem:[#allocation4 + $0x8] sm:$0xff] %v182_v43 }
  0xa6   : > { %v222_v60 = vpop.permute.xlu1 %221  ;;  %v220_v61 = vpop.permute.xlu0 %219 }
  0xa7   : > { %v224_v4 = vadd.f32 %v222_v60, %v218_v24  ;;  %v223_v5 = vadd.f32 %v220_v61, %v217_v25  ;;  %v284_v25 = vshrl.u32 %v283_v18, 7 }
  0xa8   : > { %v189_v44 = vld [vmem:[#allocation2 + $0x1] sm:$0xff]  ;;  %v190_v45 = vld [vmem:[#allocation2 + $0x9] sm:$0xff]  ;;  %v233_v48 = vld [vmem:[#allocation4 + $0x1] sm:$0xff] }
  0xa9   : > { %v191_v46 = vadd.f32 %v189_v44, %v169_v34  ;;  %v192_v47 = vadd.f32 %v190_v45, %v170_v42  ;;  %v193_v49 = vld [vmem:[#allocation2 + $0x2] sm:$0xff]  ;;  %v194_v50 = vld [vmem:[#allocation2 + $0xa] sm:$0xff]  ;;  %v234_v51 = vld [vmem:[#allocation4 + $0x9] sm:$0xff]  ;;  %v235_v54 = vadd.f32 %v233_v48, %v181_v35  ;;  %v285_v32 = vadd.s32 8, %v284_v25 }
  0xaa   : > { %v236_v55 = vadd.f32 %v234_v51, %v182_v43  ;;  %v237_v56 = vld [vmem:[#allocation4 + $0x2] sm:$0xff]  ;;  %v238_v57 = vld [vmem:[#allocation4 + $0xa] sm:$0xff]  ;;  %v228_v62 = vpop.permute.xlu1 %227  ;;  %v226_v63 = vpop.permute.xlu0 %225  ;;  %v287_v35 = vadd.s32 %v286_v33, %v284_v25 }
  0xab   : > { %v195_v52 = vadd.f32 %v193_v49, %v191_v46  ;;  %v196_v53 = vadd.f32 %v194_v50, %v192_v47  ;;  %v239_v58 = vadd.f32 %v237_v56, %v235_v54  ;;  %v230_v12 = vadd.f32 %v228_v62, %v224_v4 }
  0xac   : > { %v240_v59 = vadd.f32 %v238_v57, %v236_v55  ;;  %v229_v13 = vadd.f32 %v226_v63, %v223_v5  ;;  %v288_v34 = vadd.s32 %v286_v33, %v285_v32  ;;  %vm291_vm2 = vcmp.ge.s32.totalorder %v287_v35, 2 }
  0xad   : > { %197 = vrot.lane.b32.xlu0 %v195_v52, %s605_s3  ;;  %199 = vrot.lane.b32.xlu1 %v196_v53, %s605_s3  ;;  %vm293_vm3 = vcmp.lt.s32.totalorder %v287_v35, 62 }
  0xae   : > { %vm292_vm0 = vcmp.ge.s32.totalorder %v288_v34, 2  ;;  %vm294_vm1 = vcmp.lt.s32.totalorder %v288_v34, 62  ;;  %vm730_vm6 = vmand %vm291_vm2, %vm293_vm3 }
  0xaf   : > { %vm726_vm4 = vmand %vm292_vm0, %vm294_vm1 }
  0xb0   : > { %vm299_vm11 = vmand %vm726_vm4, %vm297_vm5 }
  0xb1   : > { %241 = vrot.lane.b32.xlu0 %v239_v58, %s605_s3  ;;  %243 = vrot.lane.b32.xlu1 %v240_v59, %s605_s3  ;;  %vm298_vm13 = vmand %vm730_vm6, %vm297_vm5 }
  0xb2   : > { %vm302_vm14 = vmand %vm299_vm11, %vm300_vm7 }
  0xb3   : > { %vm301_vm15 = vmand %vm298_vm13, %vm300_vm7 }
  0xb5   : > { %203 = vrot.lane.b32.xlu0 %v195_v52, %s606_s4  ;;  %205 = vrot.lane.b32.xlu1 %v196_v53, %s606_s4 }
  0xb9   : > { %247 = vrot.lane.b32.xlu0 %v239_v58, %s606_s4  ;;  %249 = vrot.lane.b32.xlu1 %v240_v59, %s606_s4 }
 0x11f   : > { %v200_v0 = vpop.permute.xlu1 %199  ;;  %v198_v1 = vpop.permute.xlu0 %197 }
 0x120   : > { %v202_v6 = vadd.f32 %v200_v0, %v196_v53  ;;  %v201_v7 = vadd.f32 %v198_v1, %v195_v52 }
 0x123   : > { %v244_v2 = vpop.permute.xlu1 %243  ;;  %v242_v3 = vpop.permute.xlu0 %241 }
 0x124   : > { %v246_v14 = vadd.f32 %v244_v2, %v240_v59  ;;  %v245_v15 = vadd.f32 %v242_v3, %v239_v58 }
 0x127   : > { %v206_v8 = vpop.permute.xlu1 %205  ;;  %v204_v9 = vpop.permute.xlu0 %203 }
 0x128   : > { %v208_v10 = vadd.f32 %v206_v8, %v202_v6  ;;  %v207_v11 = vadd.f32 %v204_v9, %v201_v7 }
 0x12a   : > { %v256_v19 = vsub.f32 %v208_v10, %v230_v12  ;;  %v255_v20 = vsub.f32 %v207_v11, %v229_v13  ;;  %v254_v42 = vadd.f32 %v230_v12, %v208_v10  ;;  %v253_v47 = vadd.f32 %v229_v13, %v207_v11 }
 0x12b   : > { %v250_v16 = vpop.permute.xlu1 %249  ;;  %v248_v17 = vpop.permute.xlu0 %247 }
 0x12c   : > { %v252_v21 = vadd.f32 %v250_v16, %v246_v14  ;;  %v251_v22 = vadd.f32 %v248_v17, %v245_v15  ;;  %v258_v26 = vmul.f32 %v256_v19, %v256_v19  ;;  %v257_v27 = vmul.f32 %v255_v20, %v255_v20 }
 0x12e   : > { %v260_v23 = vmul.f32 4.0, %v252_v21  ;;  %v259_v24 = vmul.f32 4.0, %v251_v22 }
 0x130   : > { %v262_v28 = vmul.f32 %v260_v23, %v252_v21  ;;  %v261_v29 = vmul.f32 %v259_v24, %v251_v22 }
 0x132   : > { %v264_v30 = vadd.f32 %v262_v28, %v258_v26  ;;  %v263_v31 = vadd.f32 %v261_v29, %v257_v27 }
 0x134   : > { %505 = vrsqrt.f32 %v264_v30  ;;  %vm274_vm8 = vcmp.eq.f32.partialorder %v264_v30, inf  ;;  %v277_v44 = vand.u32 2147483648, %v264_v30  ;;  %vm267_vm9 = vcmp.eq.f32.partialorder %v263_v31, inf }
 0x135   : > { %507 = vrsqrt.f32 %v263_v31  ;;  %v270_v45 = vand.u32 2147483648, %v263_v31  ;;  %vm276_vm10 = vcmp.eq.f32.partialorder %v264_v30, 0.0  ;;  %vm269_vm12 = vcmp.eq.f32.partialorder %v263_v31, 0.0 }
 0x13e   : > { %v506_v37 = vpop.eup %505 }
 0x13f   : > { %v508_v39 = vpop.eup %507  ;;  %v273_v40 = vmul.f32 %v506_v37, %v264_v30 }
 0x140   : > { %v266_v43 = vmul.f32 %v508_v39, %v263_v31 }
 0x141   : > { %v275_v46 = vsel %vm274_vm8, %v264_v30, %v273_v40 }
 0x142   : > { %v268_v48 = vsel %vm267_vm9, %v263_v31, %v266_v43  ;;  %v278_v49 = vsel %vm276_vm10, %v277_v44, %v275_v46 }
 0x143   : > { %v271_v50 = vsel %vm269_vm12, %v270_v45, %v268_v48  ;;  %v280_v51 = vsub.f32 %v254_v42, %v278_v49 }
 0x144   : > { %v279_v52 = vsub.f32 %v253_v47, %v271_v50 }
 0x145   : > { %v282_v53 = vmul.f32 0.5, %v280_v51 }
 0x146   : > { %v281_v54 = vmul.f32 0.5, %v279_v52 }
 0x147   : > { %v304_v55 = vsel %vm302_vm14, %v282_v53, 0.0 }
 0x148   : > { %v303_v56 = vsel %vm301_vm15, %v281_v54, 0.0  ;;  %306 = vst [vmem:[%s123_s21 + $0x8] sm:$0xff] %v304_v55 }
 0x149   : > { %305 = vst [vmem:[%s123_s21] sm:$0xff] %v303_v56 }
 0x14a   : > { %522 = shalt.err (!%p519_p6)
}
 0x14b   : > { %s523_s3 = scalar_lea.hbm %s746_s26, 256  ;;  %s527_s14 = scalar_lea.hbm %s805_s1, 2048 }
 0x14c   : > { %p524_p7 = scmp.ne.s32.totalorder %s746_s26, %s523_s3  ;;  %p528_p11 = scmp.lt.u32.totalorder %s746_s26, %s805_s1 }
 0x14d   : > { %p529_p12 = scmp.lt.u32.totalorder %s527_s14, %s523_s3  ;;  %p531_p0 = scmp.lt.u32.totalorder %s523_s3, %s746_s26 }
 0x14e   : > { %p525_p9 = pnand %p524_p7, %p671_p3 }
 0x14f   : > { %p530_p13 = por %p529_p12, %p528_p11 }
 0x150   : > { %p526_p10 = pneg %p525_p9 }
 0x151   : > { %p532_p1 = por %p531_p0, %p530_p13 }
 0x153   : > { %p533_p2 = pnand %p532_p1, %p526_p10 }
 0x155   : > { %536 = shalt.err (!%p533_p2)
}
 0x156   : > { %s608_s9 = smov 128   ;;  %s609_s10 = smov 8  }
 0x157   : > { %430 = dma.vmem_to_hbm [thread:$0]  (%p671_p3), %s748_s22, 256, %s746_s26, %s752_s27, %s608_s9, %s608_s9, %s609_s10  }
 0x158 PF: > { %p436_p4 = scmp.ge.s32.totalorder %s603_s13, 2  ;;  %s338_s21 = sand.u32 1, %s575_s6  }
 0x159   : > { %s339_s23 = scalar_lea.sflag [#allocation6], %s338_s21 }
 0x15a   : > { %p433_p5 = pnand %p436_p4, %p680_p8 }
 0x15c   : > { %570 = dma.done.wait (!%p433_p5), %s339_s23, 256  }
 0x15d   : > { %572 = vsyncadd (!%p433_p5), %s339_s23, 4294967040  ;;  %s14_s13 = sadd.s32 1, %s603_s13   ;;  %s812_s6 = smov %s579_s7 }
 0x15e   : > { %p11_p6 = scmp.ge.s32.totalorder %s14_s13, 10   ;;  %s813_s7 = smov %s583_s8 }
 0x15f   : > { %s814_s8 = smov %s689_s24  ;;  %s815_s9 = smov %s595_s11 }
 0x160   : > { %s816_s10 = smov %s599_s12  ;;  %s817_s11 = smov %s820_s16 }
 0x161   : > { %s818_s12 = smov %s824_s17  ;;  %13 = sbr.rel (!%p11_p6) target bundleno = 5 (0x5), region = 62 }
 0x168   :  { %344 = vsyncpa [#allocation6], 1 }
 0x169   :  { %346 = vsyncpa [#allocation6 + $0x1], 1 }

</bundles_post_ra>
